<compile_context>
chip_gen: v7x
topology: tpu7x:2x2x1
jax: 0.10.0
libtpu: 0.0.40
codegen_flags: <defaults>
</compile_context>

<pallas_src>
import jax
import jax.numpy as jnp
from jax.experimental import pallas as pl
from jax.experimental.pallas import tpu as pltpu


# ----------------------------- Pallas kernel --------------------------------

def feature_transform_kernel(x_ref,
                             w1_ref, b1_ref, w2_ref, b2_ref, w3_ref, b3_ref,
                             wc1_ref, bc1_ref, wc2_ref, bc2_ref,
                             o_ref):
    compute_dtype = w1_ref.dtype            # bf16 (dot inputs), accumulate in f32

    x = x_ref[...]                          # (bm, L) bf16

    # ---- mlp: Linear+BN(folded) -> ReLU -> Linear+BN(folded) -> ReLU -> Linear
    h = jnp.dot(x, w1_ref[...], preferred_element_type=jnp.float32) + b1_ref[...]
    h = jnp.maximum(h, 0.0).astype(compute_dtype)

    h = jnp.dot(h, w2_ref[...], preferred_element_type=jnp.float32) + b2_ref[...]
    h = jnp.maximum(h, 0.0).astype(compute_dtype)

    y = jnp.dot(h, w3_ref[...], preferred_element_type=jnp.float32) + b3_ref[...]

    # ---- correction(y): Linear+BN(folded) -> ReLU -> Linear
    c = jnp.dot(y.astype(compute_dtype), wc1_ref[...],
                preferred_element_type=jnp.float32) + bc1_ref[...]
    c = jnp.maximum(c, 0.0).astype(compute_dtype)
    c = jnp.dot(c, wc2_ref[...], preferred_element_type=jnp.float32) + bc2_ref[...]

    # ---- residual: y + correction(y)
    o_ref[...] = (y + c).astype(o_ref.dtype)


def feature_transform_forward(latent_x, params, *, block_b=None):
    """latent_x: (B, L) f32.  params: folded / pre-transposed weights (see fold_params)."""
    B, L = latent_x.shape
    if block_b is None:
        block_b = min(B, 256)          # full MXU height on v6e/v7x for large batches
    assert B % block_b == 0, (B, block_b)

    weight_names = ("w1", "b1", "w2", "b2", "w3", "b3", "wc1", "bc1", "wc2", "bc2")
    weights = [params[n] for n in weight_names]

    def resident(shape):               # weights/biases stay resident across the grid
        return pl.BlockSpec(shape, lambda i: (0,) * len(shape))

    x_spec = pl.BlockSpec((block_b, L), lambda i: (i, 0))
    out_spec = pl.BlockSpec((block_b, L), lambda i: (i, 0))

    return pl.pallas_call(
        feature_transform_kernel,
        out_shape=jax.ShapeDtypeStruct((B, L), jnp.float32),
        grid=(B // block_b,),
        in_specs=[x_spec] + [resident(w.shape) for w in weights],
        out_specs=out_spec,
        compiler_params=pltpu.CompilerParams(
            dimension_semantics=("parallel",)),
    )(latent_x.astype(params["w1"].dtype), *weights)


# -------------------------- parameter construction --------------------------

def make_raw_params(latent_size, key):
    """PyTorch-convention params: Linear W (out,in), b (out,), eval-mode BN stats."""
    ks = jax.random.split(key, 8)
    L = latent_size

    def linear(k, fan_in, fan_out):
        bound = 1.0 / jnp.sqrt(fan_in)
        kw, kb = jax.random.split(k)
        W = jax.random.uniform(kw, (fan_out, fan_in), jnp.float32, -bound, bound)
        b = jax.random.uniform(kb, (fan_out,), jnp.float32, -bound, bound)
        return W, b

    def batchnorm(k, n):
        kg, kb, km, kv = jax.random.split(k, 4)
        return dict(
            gamma=jax.random.uniform(kg, (n,), jnp.float32, 0.5, 1.5),
            beta=0.1 * jax.random.normal(kb, (n,), jnp.float32),
            mean=0.1 * jax.random.normal(km, (n,), jnp.float32),
            var=jax.random.uniform(kv, (n,), jnp.float32, 0.5, 1.5),
            eps=1e-5,
        )

    raw = {}
    raw["W1"], raw["b1"] = linear(ks[0], L, L); raw["bn1"] = batchnorm(ks[1], L)
    raw["W2"], raw["b2"] = linear(ks[2], L, L); raw["bn2"] = batchnorm(ks[3], L)
    raw["W3"], raw["b3"] = linear(ks[4], L, L)
    raw["Wc1"], raw["bc1"] = linear(ks[5], L, L); raw["bnc1"] = batchnorm(ks[6], L)
    raw["Wc2"], raw["bc2"] = linear(ks[7], L, L)
    return raw


def _fold_bn(W, b, bn):
    """Fold eval-mode BatchNorm1d into the preceding Linear (PyTorch (out,in) W)."""
    s = bn["gamma"] / jnp.sqrt(bn["var"] + bn["eps"])
    return s[:, None] * W, s * b + (bn["beta"] - s * bn["mean"])


def fold_params(raw, weight_dtype=jnp.bfloat16):
    """BN-fold, pre-transpose weights to (in,out) for x @ W, cast weights to bf16."""
    W1, b1 = _fold_bn(raw["W1"], raw["b1"], raw["bn1"])
    W2, b2 = _fold_bn(raw["W2"], raw["b2"], raw["bn2"])
    W3, b3 = raw["W3"], raw["b3"]
    Wc1, bc1 = _fold_bn(raw["Wc1"], raw["bc1"], raw["bnc1"])
    Wc2, bc2 = raw["Wc2"], raw["bc2"]

    wt = lambda W: W.T.astype(weight_dtype)            # (in, out) for the MXU
    bias = lambda b: b.reshape(1, -1).astype(jnp.float32)

    return {
        "w1": wt(W1), "b1": bias(b1),
        "w2": wt(W2), "b2": bias(b2),
        "w3": wt(W3), "b3": bias(b3),
        "wc1": wt(Wc1), "bc1": bias(bc1),
        "wc2": wt(Wc2), "bc2": bias(bc2),
    }


# ------------------------------- references ---------------------------------

def reference_forward_torch_semantics(x, raw):
    """Eval-mode PyTorch forward in f32 with explicit BatchNorm1d."""
    def bn(z, p):
        return p["gamma"] * (z - p["mean"]) / jnp.sqrt(p["var"] + p["eps"]) + p["beta"]

    h = jax.nn.relu(bn(x @ raw["W1"].T + raw["b1"], raw["bn1"]))
    h = jax.nn.relu(bn(h @ raw["W2"].T + raw["b2"], raw["bn2"]))
    y = h @ raw["W3"].T + raw["b3"]
    c = jax.nn.relu(bn(y @ raw["Wc1"].T + raw["bc1"], raw["bnc1"]))
    c = c @ raw["Wc2"].T + raw["bc2"]
    return y + c


def reference_forward_folded(x, params):
    """Same math as the kernel (folded params, matching dtypes), in plain JAX."""
    cd = params["w1"].dtype
    h = jnp.dot(x.astype(cd), params["w1"], preferred_element_type=jnp.float32) + params["b1"]
    h = jnp.maximum(h, 0.0).astype(cd)
    h = jnp.dot(h, params["w2"], preferred_element_type=jnp.float32) + params["b2"]
    h = jnp.maximum(h, 0.0).astype(cd)
    y = jnp.dot(h, params["w3"], preferred_element_type=jnp.float32) + params["b3"]
    c = jnp.dot(y.astype(cd), params["wc1"], preferred_element_type=jnp.float32) + params["bc1"]
    c = jnp.maximum(c, 0.0).astype(cd)
    c = jnp.dot(c, params["wc2"], preferred_element_type=jnp.float32) + params["bc2"]
    return y + c


# ----------------------------------- main ------------------------------------

if __name__ == "__main__":
    key = jax.random.PRNGKey(0)
    k_param, k_x = jax.random.split(key)

    B = 8          # small batch
    LATENT = 256   # module default is 1024; small but lane/MXU aligned

    raw = make_raw_params(LATENT, k_param)
    x = jax.random.normal(k_x, (B, LATENT), dtype=jnp.float32)

    # 1) BN-folding algebra check (pure f32, no quantization involved).
    folded_f32 = fold_params(raw, weight_dtype=jnp.float32)
    ref_torch = reference_forward_torch_semantics(x, raw)
    ref_fold32 = reference_forward_folded(x, folded_f32)
    assert jnp.allclose(ref_fold32, ref_torch, atol=1e-3, rtol=1e-3), (
        f"fold max abs err {float(jnp.max(jnp.abs(ref_fold32 - ref_torch)))}")

    # 2) Pallas kernel (bf16 weights, f32 accumulation) vs identical-math JAX ref.
    params = fold_params(raw, weight_dtype=jnp.bfloat16)
    out = feature_transform_forward(x, params)
    out = jax.block_until_ready(out)
    assert out.shape == (B, LATENT), out.shape

    ref_bf16 = reference_forward_folded(x, params)
    assert jnp.allclose(out, ref_bf16, atol=1e-2, rtol=1e-2), (
        f"kernel max abs err {float(jnp.max(jnp.abs(out - ref_bf16)))}")

    print("KERNEL_OK")
</pallas_src>

<mosaic_0001>
module attributes {stable_mosaic.version = 11 : i64} {
  func.func @feature_transform_kernel(%arg0: i32, %arg1: memref<8x256xbf16, #tpu.memory_space<vmem>>, %arg2: memref<256x256xbf16, #tpu.memory_space<vmem>>, %arg3: memref<1x256xf32, #tpu.memory_space<vmem>>, %arg4: memref<256x256xbf16, #tpu.memory_space<vmem>>, %arg5: memref<1x256xf32, #tpu.memory_space<vmem>>, %arg6: memref<256x256xbf16, #tpu.memory_space<vmem>>, %arg7: memref<1x256xf32, #tpu.memory_space<vmem>>, %arg8: memref<256x256xbf16, #tpu.memory_space<vmem>>, %arg9: memref<1x256xf32, #tpu.memory_space<vmem>>, %arg10: memref<256x256xbf16, #tpu.memory_space<vmem>>, %arg11: memref<1x256xf32, #tpu.memory_space<vmem>>, %arg12: memref<8x256xf32, #tpu.memory_space<vmem>>) attributes {dimension_semantics = [#tpu.dimension_semantics<parallel>], iteration_bounds = array<i64: 1>, scalar_prefetch = 0 : i64, scratch_operands = 0 : i64, tpu.core_type = #tpu.core_type<tc>, window_params = [{transform_indices = @transform_0, window_bounds = array<i64: 8, 256>}, {pipeline_mode = #tpu.pipeline_mode<synchronous>, transform_indices = @transform_1, window_bounds = array<i64: 256, 256>}, {pipeline_mode = #tpu.pipeline_mode<synchronous>, transform_indices = @transform_2, window_bounds = array<i64: 1, 256>}, {pipeline_mode = #tpu.pipeline_mode<synchronous>, transform_indices = @transform_3, window_bounds = array<i64: 256, 256>}, {pipeline_mode = #tpu.pipeline_mode<synchronous>, transform_indices = @transform_4, window_bounds = array<i64: 1, 256>}, {pipeline_mode = #tpu.pipeline_mode<synchronous>, transform_indices = @transform_5, window_bounds = array<i64: 256, 256>}, {pipeline_mode = #tpu.pipeline_mode<synchronous>, transform_indices = @transform_6, window_bounds = array<i64: 1, 256>}, {pipeline_mode = #tpu.pipeline_mode<synchronous>, transform_indices = @transform_7, window_bounds = array<i64: 256, 256>}, {pipeline_mode = #tpu.pipeline_mode<synchronous>, transform_indices = @transform_8, window_bounds = array<i64: 1, 256>}, {pipeline_mode = #tpu.pipeline_mode<synchronous>, transform_indices = @transform_9, window_bounds = array<i64: 256, 256>}, {pipeline_mode = #tpu.pipeline_mode<synchronous>, transform_indices = @transform_10, window_bounds = array<i64: 1, 256>}, {transform_indices = @transform_11, window_bounds = array<i64: 8, 256>}]} {
    %c0 = arith.constant 0 : index
    %c0_0 = arith.constant 0 : index
    %0 = vector.load %arg1[%c0, %c0_0] : memref<8x256xbf16, #tpu.memory_space<vmem>>, vector<8x256xbf16>
    %c0_1 = arith.constant 0 : index
    %c0_2 = arith.constant 0 : index
    %1 = vector.load %arg2[%c0_1, %c0_2] : memref<256x256xbf16, #tpu.memory_space<vmem>>, vector<256x256xbf16>
    %cst = arith.constant dense<0.000000e+00> : vector<8x256xf32>
    %2 = tpu.matmul %0, %1, %cst {dimension_numbers = #tpu.dot_dimension_numbers<[1], [0], [0], [1], [0, 0, 1, 1], [], []>} : vector<8x256xbf16>, vector<256x256xbf16>, vector<8x256xf32> -> vector<8x256xf32>
    %c0_3 = arith.constant 0 : index
    %c0_4 = arith.constant 0 : index
    %3 = vector.load %arg3[%c0_3, %c0_4] : memref<1x256xf32, #tpu.memory_space<vmem>>, vector<1x256xf32>
    %4 = vector.broadcast %3 : vector<1x256xf32> to vector<8x256xf32>
    %5 = arith.addf %2, %4 : vector<8x256xf32>
    %cst_5 = arith.constant 0.000000e+00 : f32
    %6 = vector.broadcast %cst_5 : f32 to vector<8x256xf32>
    %7 = arith.maximumf %5, %6 : vector<8x256xf32>
    %8 = arith.truncf %7 : vector<8x256xf32> to vector<8x256xbf16>
    %c0_6 = arith.constant 0 : index
    %c0_7 = arith.constant 0 : index
    %9 = vector.load %arg4[%c0_6, %c0_7] : memref<256x256xbf16, #tpu.memory_space<vmem>>, vector<256x256xbf16>
    %cst_8 = arith.constant dense<0.000000e+00> : vector<8x256xf32>
    %10 = tpu.matmul %8, %9, %cst_8 {dimension_numbers = #tpu.dot_dimension_numbers<[1], [0], [0], [1], [0, 0, 1, 1], [], []>} : vector<8x256xbf16>, vector<256x256xbf16>, vector<8x256xf32> -> vector<8x256xf32>
    %c0_9 = arith.constant 0 : index
    %c0_10 = arith.constant 0 : index
    %11 = vector.load %arg5[%c0_9, %c0_10] : memref<1x256xf32, #tpu.memory_space<vmem>>, vector<1x256xf32>
    %12 = vector.broadcast %11 : vector<1x256xf32> to vector<8x256xf32>
    %13 = arith.addf %10, %12 : vector<8x256xf32>
    %cst_11 = arith.constant 0.000000e+00 : f32
    %14 = vector.broadcast %cst_11 : f32 to vector<8x256xf32>
    %15 = arith.maximumf %13, %14 : vector<8x256xf32>
    %16 = arith.truncf %15 : vector<8x256xf32> to vector<8x256xbf16>
    %c0_12 = arith.constant 0 : index
    %c0_13 = arith.constant 0 : index
    %17 = vector.load %arg6[%c0_12, %c0_13] : memref<256x256xbf16, #tpu.memory_space<vmem>>, vector<256x256xbf16>
    %cst_14 = arith.constant dense<0.000000e+00> : vector<8x256xf32>
    %18 = tpu.matmul %16, %17, %cst_14 {dimension_numbers = #tpu.dot_dimension_numbers<[1], [0], [0], [1], [0, 0, 1, 1], [], []>} : vector<8x256xbf16>, vector<256x256xbf16>, vector<8x256xf32> -> vector<8x256xf32>
    %c0_15 = arith.constant 0 : index
    %c0_16 = arith.constant 0 : index
    %19 = vector.load %arg7[%c0_15, %c0_16] : memref<1x256xf32, #tpu.memory_space<vmem>>, vector<1x256xf32>
    %20 = vector.broadcast %19 : vector<1x256xf32> to vector<8x256xf32>
    %21 = arith.addf %18, %20 : vector<8x256xf32>
    %22 = arith.truncf %21 : vector<8x256xf32> to vector<8x256xbf16>
    %c0_17 = arith.constant 0 : index
    %c0_18 = arith.constant 0 : index
    %23 = vector.load %arg8[%c0_17, %c0_18] : memref<256x256xbf16, #tpu.memory_space<vmem>>, vector<256x256xbf16>
    %cst_19 = arith.constant dense<0.000000e+00> : vector<8x256xf32>
    %24 = tpu.matmul %22, %23, %cst_19 {dimension_numbers = #tpu.dot_dimension_numbers<[1], [0], [0], [1], [0, 0, 1, 1], [], []>} : vector<8x256xbf16>, vector<256x256xbf16>, vector<8x256xf32> -> vector<8x256xf32>
    %c0_20 = arith.constant 0 : index
    %c0_21 = arith.constant 0 : index
    %25 = vector.load %arg9[%c0_20, %c0_21] : memref<1x256xf32, #tpu.memory_space<vmem>>, vector<1x256xf32>
    %26 = vector.broadcast %25 : vector<1x256xf32> to vector<8x256xf32>
    %27 = arith.addf %24, %26 : vector<8x256xf32>
    %cst_22 = arith.constant 0.000000e+00 : f32
    %28 = vector.broadcast %cst_22 : f32 to vector<8x256xf32>
    %29 = arith.maximumf %27, %28 : vector<8x256xf32>
    %30 = arith.truncf %29 : vector<8x256xf32> to vector<8x256xbf16>
    %c0_23 = arith.constant 0 : index
    %c0_24 = arith.constant 0 : index
    %31 = vector.load %arg10[%c0_23, %c0_24] : memref<256x256xbf16, #tpu.memory_space<vmem>>, vector<256x256xbf16>
    %cst_25 = arith.constant dense<0.000000e+00> : vector<8x256xf32>
    %32 = tpu.matmul %30, %31, %cst_25 {dimension_numbers = #tpu.dot_dimension_numbers<[1], [0], [0], [1], [0, 0, 1, 1], [], []>} : vector<8x256xbf16>, vector<256x256xbf16>, vector<8x256xf32> -> vector<8x256xf32>
    %c0_26 = arith.constant 0 : index
    %c0_27 = arith.constant 0 : index
    %33 = vector.load %arg11[%c0_26, %c0_27] : memref<1x256xf32, #tpu.memory_space<vmem>>, vector<1x256xf32>
    %34 = vector.broadcast %33 : vector<1x256xf32> to vector<8x256xf32>
    %35 = arith.addf %32, %34 : vector<8x256xf32>
    %36 = arith.addf %21, %35 : vector<8x256xf32>
    %c0_28 = arith.constant 0 : index
    %c0_29 = arith.constant 0 : index
    %37 = vector.load %arg12[%c0_28, %c0_29] : memref<8x256xf32, #tpu.memory_space<vmem>>, vector<8x256xf32>
    tpu.vector_store %arg12[%c0_28, %c0_29], %36 {strides = array<i32>} : memref<8x256xf32, #tpu.memory_space<vmem>>, vector<8x256xf32>,
    return
  }
  func.func @transform_0(%arg0: i32) -> (i32, i32) {
    %c0_i32 = arith.constant 0 : i32
    %c0_i32_0 = arith.constant 0 : i32
    return %arg0, %c0_i32 : i32, i32
  }
  func.func @transform_1(%arg0: i32) -> (i32, i32) {
    %c0_i32 = arith.constant 0 : i32
    %c0_i32_0 = arith.constant 0 : i32
    %c0_i32_1 = arith.constant 0 : i32
    return %c0_i32, %c0_i32_0 : i32, i32
  }
  func.func @transform_2(%arg0: i32) -> (i32, i32) {
    %c0_i32 = arith.constant 0 : i32
    %c0_i32_0 = arith.constant 0 : i32
    %c0_i32_1 = arith.constant 0 : i32
    return %c0_i32, %c0_i32_0 : i32, i32
  }
  func.func @transform_3(%arg0: i32) -> (i32, i32) {
    %c0_i32 = arith.constant 0 : i32
    %c0_i32_0 = arith.constant 0 : i32
    %c0_i32_1 = arith.constant 0 : i32
    return %c0_i32, %c0_i32_0 : i32, i32
  }
  func.func @transform_4(%arg0: i32) -> (i32, i32) {
    %c0_i32 = arith.constant 0 : i32
    %c0_i32_0 = arith.constant 0 : i32
    %c0_i32_1 = arith.constant 0 : i32
    return %c0_i32, %c0_i32_0 : i32, i32
  }
  func.func @transform_5(%arg0: i32) -> (i32, i32) {
    %c0_i32 = arith.constant 0 : i32
    %c0_i32_0 = arith.constant 0 : i32
    %c0_i32_1 = arith.constant 0 : i32
    return %c0_i32, %c0_i32_0 : i32, i32
  }
  func.func @transform_6(%arg0: i32) -> (i32, i32) {
    %c0_i32 = arith.constant 0 : i32
    %c0_i32_0 = arith.constant 0 : i32
    %c0_i32_1 = arith.constant 0 : i32
    return %c0_i32, %c0_i32_0 : i32, i32
  }
  func.func @transform_7(%arg0: i32) -> (i32, i32) {
    %c0_i32 = arith.constant 0 : i32
    %c0_i32_0 = arith.constant 0 : i32
    %c0_i32_1 = arith.constant 0 : i32
    return %c0_i32, %c0_i32_0 : i32, i32
  }
  func.func @transform_8(%arg0: i32) -> (i32, i32) {
    %c0_i32 = arith.constant 0 : i32
    %c0_i32_0 = arith.constant 0 : i32
    %c0_i32_1 = arith.constant 0 : i32
    return %c0_i32, %c0_i32_0 : i32, i32
  }
  func.func @transform_9(%arg0: i32) -> (i32, i32) {
    %c0_i32 = arith.constant 0 : i32
    %c0_i32_0 = arith.constant 0 : i32
    %c0_i32_1 = arith.constant 0 : i32
    return %c0_i32, %c0_i32_0 : i32, i32
  }
  func.func @transform_10(%arg0: i32) -> (i32, i32) {
    %c0_i32 = arith.constant 0 : i32
    %c0_i32_0 = arith.constant 0 : i32
    %c0_i32_1 = arith.constant 0 : i32
    return %c0_i32, %c0_i32_0 : i32, i32
  }
  func.func @transform_11(%arg0: i32) -> (i32, i32) {
    %c0_i32 = arith.constant 0 : i32
    %c0_i32_0 = arith.constant 0 : i32
    return %arg0, %c0_i32 : i32, i32
  }
}

</mosaic_0001>

<bundles_post_ra>
// kernel: tpu_custom_call.1
= control target key start
LH: loop header
LB: loop body
LE: loop exit
PB: predicated region body
PF: predicated region fallthrough
CT: control target
= control target key end

     0   :  { %16 = vsyncpa [#allocation3], 0  ;;  %s2168_s0 = inlined_call_operand.hbm [shape: bf16[8,256], index: 0, kind: input, shape index: {}]   ;;  %s2169_s1 = inlined_call_operand.hbm [shape: bf16[256,256], index: 1, kind: input, shape index: {}]   ;;  %s2170_s2 = inlined_call_operand.vmem [shape: f32[1,256], index: 2, kind: input, shape index: {}]   ;;  %s2171_s3 = inlined_call_operand.hbm [shape: bf16[256,256], index: 3, kind: input, shape index: {}]   ;;  %s2172_s4 = inlined_call_operand.vmem [shape: f32[1,256], index: 4, kind: input, shape index: {}]   ;;  %s2173_s5 = inlined_call_operand.hbm [shape: bf16[256,256], index: 5, kind: input, shape index: {}]   ;;  %s2174_s6 = inlined_call_operand.vmem [shape: f32[1,256], index: 6, kind: input, shape index: {}]   ;;  %s2175_s7 = inlined_call_operand.hbm [shape: bf16[256,256], index: 7, kind: input, shape index: {}]   ;;  %s2176_s8 = inlined_call_operand.vmem [shape: f32[1,256], index: 8, kind: input, shape index: {}]   ;;  %s2177_s9 = inlined_call_operand.hbm [shape: bf16[256,256], index: 9, kind: input, shape index: {}]   ;;  %s2178_s10 = inlined_call_operand.vmem [shape: f32[1,256], index: 10, kind: input, shape index: {}]   ;;  %s2179_s11 = inlined_call_operand.hbm [shape: f32[8,256], index: 11, kind: output, shape index: {}]  }
   0x1   :  { %17 = vsyncpa [#allocation6], 0 }
   0x2   :  { %18 = vsyncpa [#allocation9], 0 }
   0x3   :  { %19 = vsyncpa [#allocation12], 0 }
   0x4   :  { %20 = vsyncpa [#allocation4], 0  ;;  %s1965_s17 = smov [#allocation5]   ;;  %s1801_s21 = scalar_lea.hbm %s2169_s1, 4096 }
   0x5   :  { %s36_s18 = sshll.u32 %s1965_s17, 4  ;;  %p1802_p0 = scmp.ne.s32.totalorder %s2169_s1, %s1801_s21  ;;  %s37_s18 = int_to_ptr.vmem [resolvable:$true] %s36_s18 }
   0x6   :  { %p1805_p1 = scmp.lt.u32.totalorder %s1801_s21, %s2169_s1 }
   0x8   :  { %p1807_p2 = pnand %p1805_p1, %p1802_p0 }
   0xa   :  { %1810 = shalt.err (!%p1807_p2)
}
   0xb   :  { %s1811_s26 = scalar_lea.vmem %s37_s18, 4096  ;;  %p1816_p4 = scmp.lt.s32.totalorder %s37_s18, %s37_s18 }
   0xc   :  { %p1812_p3 = scmp.ne.s32.totalorder %s37_s18, %s1811_s26  ;;  %p1817_p5 = scmp.lt.s32.totalorder %s1811_s26, %s1811_s26 }
   0xe   :  { %p1818_p6 = por %p1817_p5, %p1816_p4 }
  0x10   :  { %p1819_p7 = pnand %p1818_p6, %p1812_p3 }
  0x12   :  { %1822 = shalt.err (!%p1819_p7)
}
  0x13   :  { %s1966_s27 = smov 128   ;;  %s1967_s28 = smov 8  }
  0x14   :  { %42 = dma.hbm_to_vmem [thread:$0]  %s2169_s1, 4096, %s37_s18, [#allocation6], %s1966_s27, %s1966_s27, %s1967_s28  }
  0x15   :  { %s1968_s12 = smov [#allocation8]   ;;  %s1969_s14 = smov [#allocation2]  }
  0x16   :  { %s64_s13 = sshll.u32 %s1968_s12, 4  ;;  %s27_s15 = sshll.u32 %s1969_s14, 4  ;;  %s65_s13 = int_to_ptr.vmem [resolvable:$true] %s64_s13  ;;  %s28_s15 = int_to_ptr.vmem [resolvable:$true] %s27_s15 }
  0x17   :  { %s1823_s19 = scalar_lea.hbm %s2173_s5, 4096 }
  0x18   :  { %p1824_p8 = scmp.ne.s32.totalorder %s2173_s5, %s1823_s19  ;;  %p1827_p9 = scmp.lt.u32.totalorder %s1823_s19, %s2173_s5 }
  0x1a   :  { %p1829_p10 = pnand %p1827_p9, %p1824_p8 }
  0x1c   :  { %1832 = shalt.err (!%p1829_p10)
}
  0x1d   :  { %s1833_s1 = scalar_lea.vmem %s65_s13, 4096  ;;  %p1838_p12 = scmp.lt.s32.totalorder %s65_s13, %s65_s13 }
  0x1e   :  { %p1834_p11 = scmp.ne.s32.totalorder %s65_s13, %s1833_s1  ;;  %p1839_p13 = scmp.lt.s32.totalorder %s1833_s1, %s1833_s1 }
  0x20   :  { %p1840_p0 = por %p1839_p13, %p1838_p12 }
  0x22   :  { %p1841_p1 = pnand %p1840_p0, %p1834_p11 }
  0x24   :  { %1844 = shalt.err (!%p1841_p1)
}
  0x25   :  { %70 = dma.hbm_to_vmem [thread:$0]  %s2173_s5, 4096, %s65_s13, [#allocation9], %s1966_s27, %s1966_s27, %s1967_s28  }
  0x26   :  { %s1845_s29 = scalar_lea.hbm %s2168_s0, 128 }
  0x27   :  { %p1846_p2 = scmp.ne.s32.totalorder %s2168_s0, %s1845_s29  ;;  %p1849_p3 = scmp.lt.u32.totalorder %s1845_s29, %s2168_s0 }
  0x29   :  { %p1851_p4 = pnand %p1849_p3, %p1846_p2 }
  0x2b   :  { %1854 = shalt.err (!%p1851_p4)
}
  0x2c   :  { %s1855_s17 = scalar_lea.vmem %s28_s15, 128  ;;  %p1860_p6 = scmp.lt.s32.totalorder %s28_s15, %s28_s15 }
  0x2d   :  { %p1856_p5 = scmp.ne.s32.totalorder %s28_s15, %s1855_s17  ;;  %p1861_p7 = scmp.lt.s32.totalorder %s1855_s17, %s1855_s17 }
  0x2f   :  { %p1862_p8 = por %p1861_p7, %p1860_p6 }
  0x31   :  { %p1863_p9 = pnand %p1862_p8, %p1856_p5 }
  0x33   :  { %1866 = shalt.err (!%p1863_p9)
}
  0x34   :  { %30 = dma.hbm_to_vmem [thread:$0]  %s2168_s0, 128, %s28_s15, [#allocation3]  }
  0x35   :  { %s1970_s19 = smov [#allocation7]   ;;  %s1971_s21 = smov [#allocation10]  }
  0x36   :  { %s50_s20 = sshll.u32 %s1970_s19, 4  ;;  %s78_s22 = sshll.u32 %s1971_s21, 4  ;;  %s51_s20 = int_to_ptr.vmem [resolvable:$true] %s50_s20  ;;  %s79_s22 = int_to_ptr.vmem [resolvable:$true] %s78_s22 }
  0x37   :  { %s1867_s18 = scalar_lea.hbm %s2171_s3, 4096 }
  0x38   :  { %p1868_p10 = scmp.ne.s32.totalorder %s2171_s3, %s1867_s18  ;;  %p1871_p11 = scmp.lt.u32.totalorder %s1867_s18, %s2171_s3 }
  0x3a   :  { %p1873_p12 = pnand %p1871_p11, %p1868_p10 }
  0x3c   :  { %1876 = shalt.err (!%p1873_p12)
}
  0x3d   :  { %s1877_s0 = scalar_lea.vmem %s51_s20, 4096  ;;  %p1882_p0 = scmp.lt.s32.totalorder %s51_s20, %s51_s20 }
  0x3e   :  { %p1878_p13 = scmp.ne.s32.totalorder %s51_s20, %s1877_s0  ;;  %p1883_p1 = scmp.lt.s32.totalorder %s1877_s0, %s1877_s0 }
  0x40   :  { %p1884_p2 = por %p1883_p1, %p1882_p0 }
  0x42   :  { %p1885_p3 = pnand %p1884_p2, %p1878_p13 }
  0x44   :  { %1888 = shalt.err (!%p1885_p3)
}
  0x45   :  { %56 = dma.hbm_to_vmem [thread:$0]  %s2171_s3, 4096, %s51_s20, [#allocation6], %s1966_s27, %s1966_s27, %s1967_s28  }
  0x46   :  { %s1889_s16 = scalar_lea.hbm %s2175_s7, 4096 }
  0x47   :  { %p1890_p4 = scmp.ne.s32.totalorder %s2175_s7, %s1889_s16  ;;  %p1893_p5 = scmp.lt.u32.totalorder %s1889_s16, %s2175_s7 }
  0x49   :  { %p1895_p6 = pnand %p1893_p5, %p1890_p4 }
  0x4b   :  { %1898 = shalt.err (!%p1895_p6)
}
  0x4c   :  { %s1899_s21 = scalar_lea.vmem %s79_s22, 4096  ;;  %p1904_p8 = scmp.lt.s32.totalorder %s79_s22, %s79_s22 }
  0x4d   :  { %p1900_p7 = scmp.ne.s32.totalorder %s79_s22, %s1899_s21  ;;  %p1905_p9 = scmp.lt.s32.totalorder %s1899_s21, %s1899_s21 }
  0x4f   :  { %p1906_p10 = por %p1905_p9, %p1904_p8 }
  0x51   :  { %p1907_p11 = pnand %p1906_p10, %p1900_p7 }
  0x53   :  { %1910 = shalt.err (!%p1907_p11)
}
  0x54   :  { %84 = dma.hbm_to_vmem [thread:$0]  %s2175_s7, 4096, %s79_s22, [#allocation9], %s1966_s27, %s1966_s27, %s1967_s28  }
  0x55   :  { %s1972_s23 = smov [#allocation11]   ;;  %s1911_s25 = scalar_lea.hbm %s2177_s9, 4096 }
  0x56   :  { %s92_s1 = sshll.u32 %s1972_s23, 4  ;;  %p1912_p12 = scmp.ne.s32.totalorder %s2177_s9, %s1911_s25  ;;  %s93_s1 = int_to_ptr.vmem [resolvable:$true] %s92_s1 }
  0x57   :  { %p1915_p13 = scmp.lt.u32.totalorder %s1911_s25, %s2177_s9 }
  0x59   :  { %p1917_p0 = pnand %p1915_p13, %p1912_p12 }
  0x5b   :  { %1920 = shalt.err (!%p1917_p0)
}
  0x5c   :  { %s1921_s30 = scalar_lea.vmem %s93_s1, 4096  ;;  %p1926_p2 = scmp.lt.s32.totalorder %s93_s1, %s93_s1 }
  0x5d   :  { %p1922_p1 = scmp.ne.s32.totalorder %s93_s1, %s1921_s30  ;;  %p1927_p3 = scmp.lt.s32.totalorder %s1921_s30, %s1921_s30 }
  0x5f   :  { %p1928_p4 = por %p1927_p3, %p1926_p2 }
  0x61   :  { %p1929_p5 = pnand %p1928_p4, %p1922_p1 }
  0x63   :  { %1932 = shalt.err (!%p1929_p5)
}
  0x64   :  { %98 = dma.hbm_to_vmem [thread:$0]  %s2177_s9, 4096, %s93_s1, [#allocation12], %s1966_s27, %s1966_s27, %s1967_s28  }
  0x65   :  { %1955 = dma.done.wait [#allocation3], 128  }
  0x66   :  { %1956 = vsyncadd [#allocation3], 4294967168 }
  0x67   :  { %1957 = dma.done.wait [#allocation6], 8192  }
  0x68   :  { %1958 = vsyncadd [#allocation6], 4294959104 }
  0x69   :  { %1959 = dma.done.wait [#allocation9], 8192  }
  0x6a   :  { %1960 = vsyncadd [#allocation9], 4294959104 }
  0x6b   :  { %1961 = dma.done.wait [#allocation12], 4096  }
  0x6c   :  { %1962 = vsyncadd [#allocation12], 4294963200  ;;  %v1559_v0 = vld [vmem:[#allocation5 + $0x4] ss:$8 sps:$4 sm:$0xff]   ;;  %v1561_v1 = vld [vmem:[#allocation5] ss:$8 sps:$4 sm:$0xff]  }
  0x6d   :  { %331 = vmatprep.subr.bf16.mxu0 %v1559_v0  ;;  %v1562_v2 = vld [vmem:[#allocation5 + $0x14] ss:$8 sps:$4 sm:$0xff]   ;;  %v1564_v3 = vld [vmem:[#allocation5 + $0x10] ss:$8 sps:$4 sm:$0xff]   ;;  %v1565_v4 = vld [vmem:[#allocation5 + $0x24] ss:$8 sps:$4 sm:$0xff]  }
  0x6e   :  { %332 = vmatpush1.bf16.msra.mxu0 %v1561_v1  ;;  %v1567_v5 = vld [vmem:[#allocation5 + $0x20] ss:$8 sps:$4 sm:$0xff]   ;;  %v1568_v6 = vld [vmem:[#allocation5 + $0x34] ss:$8 sps:$4 sm:$0xff]   ;;  %v1570_v7 = vld [vmem:[#allocation5 + $0x30] ss:$8 sps:$4 sm:$0xff]  }
  0x6f   :  { %333 = vmatprep.subr.bf16.mxu0 %v1562_v2  ;;  %v1571_v8 = vld [vmem:[#allocation5 + $0x44] ss:$8 sps:$4 sm:$0xff]   ;;  %v1573_v9 = vld [vmem:[#allocation5 + $0x40] ss:$8 sps:$4 sm:$0xff]   ;;  %v1574_v10 = vld [vmem:[#allocation5 + $0x54] ss:$8 sps:$4 sm:$0xff]  }
  0x70   :  { %v1576_v11 = vld [vmem:[#allocation5 + $0x50] ss:$8 sps:$4 sm:$0xff]   ;;  %v1577_v12 = vld [vmem:[#allocation5 + $0x64] ss:$8 sps:$4 sm:$0xff]   ;;  %v1579_v13 = vld [vmem:[#allocation5 + $0x60] ss:$8 sps:$4 sm:$0xff]  }
  0x71   :  { %v2121_v14 = vld [vmem:[#allocation2] sm:$0xff]  ;;  %v1609_v16 = vld [vmem:[#allocation7 + $0x4] ss:$8 sps:$4 sm:$0xff]   ;;  %v1611_v17 = vld [vmem:[#allocation7] ss:$8 sps:$4 sm:$0xff]  }
  0x72   :  { %334 = vmatpush1.bf16.msra.mxu0 %v1564_v3  ;;  %v1389_v15 = vcombine.high %v2121_v14, %v2121_v14  ;;  %v1612_v18 = vld [vmem:[#allocation7 + $0x14] ss:$8 sps:$4 sm:$0xff]   ;;  %580 = vmatprep.subr.bf16.mxu1 %v1609_v16  ;;  %v1582_v20 = vld [vmem:[#allocation5 + $0x70] ss:$8 sps:$4 sm:$0xff]   ;;  %v1615_v22 = vld [vmem:[#allocation7 + $0x24] ss:$8 sps:$4 sm:$0xff]   ;;  %v1388_v57 = vcombine.low %v2121_v14, %v2121_v14 }
  0x73   :  { %335 = vmatprep.subr.bf16.mxu0 %v1565_v4  ;;  %v1580_v19 = vld [vmem:[#allocation5 + $0x74] ss:$8 sps:$4 sm:$0xff]   ;;  %581 = vmatpush1.bf16.msra.mxu1 %v1611_v17  ;;  %v1614_v21 = vld [vmem:[#allocation7 + $0x10] ss:$8 sps:$4 sm:$0xff]   ;;  %v1583_v23 = vld [vmem:[#allocation5 + $0x84] ss:$8 sps:$4 sm:$0xff]  }
  0x74   :  { %363 = vmatprep.mubr.bf16.mxu0 %v1389_v15  ;;  %582 = vmatprep.subr.bf16.mxu1 %v1612_v18  ;;  %v1585_v24 = vld [vmem:[#allocation5 + $0x80] ss:$8 sps:$4 sm:$0xff]   ;;  %v1618_v26 = vld [vmem:[#allocation7 + $0x34] ss:$8 sps:$4 sm:$0xff]   ;;  %v1588_v28 = vld [vmem:[#allocation5 + $0x90] ss:$8 sps:$4 sm:$0xff]  }
  0x75   :  { %v1617_v25 = vld [vmem:[#allocation7 + $0x20] ss:$8 sps:$4 sm:$0xff]   ;;  %v1586_v27 = vld [vmem:[#allocation5 + $0x94] ss:$8 sps:$4 sm:$0xff]   ;;  %v1620_v29 = vld [vmem:[#allocation7 + $0x30] ss:$8 sps:$4 sm:$0xff]  }
  0x76   :  { %336 = vmatpush1.bf16.msra.mxu0 %v1567_v5  ;;  %v1621_v30 = vld [vmem:[#allocation7 + $0x44] ss:$8 sps:$4 sm:$0xff]   ;;  %v1591_v32 = vld [vmem:[#allocation5 + $0xa0] ss:$8 sps:$4 sm:$0xff]   ;;  %v1624_v34 = vld [vmem:[#allocation7 + $0x54] ss:$8 sps:$4 sm:$0xff]  }
  0x77   :  { %337 = vmatprep.subr.bf16.mxu0 %v1568_v6  ;;  %583 = vmatpush1.bf16.msra.mxu1 %v1614_v21  ;;  %v1589_v31 = vld [vmem:[#allocation5 + $0xa4] ss:$8 sps:$4 sm:$0xff]   ;;  %v1623_v33 = vld [vmem:[#allocation7 + $0x40] ss:$8 sps:$4 sm:$0xff]   ;;  %v1592_v35 = vld [vmem:[#allocation5 + $0xb4] ss:$8 sps:$4 sm:$0xff]  }
  0x78   :  { %584 = vmatprep.subr.bf16.mxu1 %v1615_v22  ;;  %v1626_v36 = vld [vmem:[#allocation7 + $0x50] ss:$8 sps:$4 sm:$0xff]   ;;  %v1627_v38 = vld [vmem:[#allocation7 + $0x64] ss:$8 sps:$4 sm:$0xff]   ;;  %v1629_v40 = vld [vmem:[#allocation7 + $0x60] ss:$8 sps:$4 sm:$0xff]  }
  0x79   :  { %v1594_v37 = vld [vmem:[#allocation5 + $0xb0] ss:$8 sps:$4 sm:$0xff]   ;;  %v1595_v39 = vld [vmem:[#allocation5 + $0xc4] ss:$8 sps:$4 sm:$0xff]   ;;  %v1597_v41 = vld [vmem:[#allocation5 + $0xc0] ss:$8 sps:$4 sm:$0xff]  }
  0x7a   :  { %338 = vmatpush1.bf16.msra.mxu0 %v1570_v7  ;;  %v1630_v42 = vld [vmem:[#allocation7 + $0x74] ss:$8 sps:$4 sm:$0xff]   ;;  %v1632_v44 = vld [vmem:[#allocation7 + $0x70] ss:$8 sps:$4 sm:$0xff]   ;;  %v1633_v46 = vld [vmem:[#allocation7 + $0x84] ss:$8 sps:$4 sm:$0xff]  }
  0x7b   :  { %339 = vmatprep.subr.bf16.mxu0 %v1571_v8  ;;  %585 = vmatpush1.bf16.msra.mxu1 %v1617_v25  ;;  %v1598_v43 = vld [vmem:[#allocation5 + $0xd4] ss:$8 sps:$4 sm:$0xff]   ;;  %v1600_v45 = vld [vmem:[#allocation5 + $0xd0] ss:$8 sps:$4 sm:$0xff]   ;;  %v1601_v47 = vld [vmem:[#allocation5 + $0xe4] ss:$8 sps:$4 sm:$0xff]  }
  0x7c   :  { %586 = vmatprep.subr.bf16.mxu1 %v1618_v26  ;;  %v1635_v48 = vld [vmem:[#allocation7 + $0x80] ss:$8 sps:$4 sm:$0xff]   ;;  %v1636_v50 = vld [vmem:[#allocation7 + $0x94] ss:$8 sps:$4 sm:$0xff]   ;;  %v1638_v52 = vld [vmem:[#allocation7 + $0x90] ss:$8 sps:$4 sm:$0xff]  }
  0x7d   :  { %v1603_v49 = vld [vmem:[#allocation5 + $0xe0] ss:$8 sps:$4 sm:$0xff]   ;;  %v1604_v51 = vld [vmem:[#allocation5 + $0xf4] ss:$8 sps:$4 sm:$0xff]   ;;  %v1606_v53 = vld [vmem:[#allocation5 + $0xf0] ss:$8 sps:$4 sm:$0xff]  }
  0x7e   :  { %340 = vmatpush1.bf16.msra.mxu0 %v1573_v9  ;;  %v1639_v54 = vld [vmem:[#allocation7 + $0xa4] ss:$8 sps:$4 sm:$0xff]   ;;  %v1641_v55 = vld [vmem:[#allocation7 + $0xa0] ss:$8 sps:$4 sm:$0xff]   ;;  %v1642_v56 = vld [vmem:[#allocation7 + $0xb4] ss:$8 sps:$4 sm:$0xff]  }
  0x7f   :  { %341 = vmatprep.subr.bf16.mxu0 %v1574_v10  ;;  %587 = vmatpush1.bf16.msra.mxu1 %v1620_v29  ;;  %v1644_v58 = vld [vmem:[#allocation7 + $0xb0] ss:$8 sps:$4 sm:$0xff]   ;;  %v1645_v59 = vld [vmem:[#allocation7 + $0xc4] ss:$8 sps:$4 sm:$0xff]   ;;  %v1647_v60 = vld [vmem:[#allocation7 + $0xc0] ss:$8 sps:$4 sm:$0xff]  }
  0x80   :  { %588 = vmatprep.subr.bf16.mxu1 %v1621_v30  ;;  %v1648_v61 = vld [vmem:[#allocation7 + $0xd4] ss:$8 sps:$4 sm:$0xff]   ;;  %v1650_v62 = vld [vmem:[#allocation7 + $0xd0] ss:$8 sps:$4 sm:$0xff]   ;;  %v1651_v63 = vld [vmem:[#allocation7 + $0xe4] ss:$8 sps:$4 sm:$0xff]  }
  0x81   :  { %v1653_v0 = vld [vmem:[#allocation7 + $0xe0] ss:$8 sps:$4 sm:$0xff]   ;;  %v1654_v1 = vld [vmem:[#allocation7 + $0xf4] ss:$8 sps:$4 sm:$0xff]   ;;  %v1656_v2 = vld [vmem:[#allocation7 + $0xf0] ss:$8 sps:$4 sm:$0xff]  }
  0x82   :  { %342 = vmatpush1.bf16.msra.mxu0 %v1576_v11  ;;  %v1657_v3 = vld [vmem:[#allocation8] ss:$8 sps:$4 sm:$0xff]   ;;  %v1659_v4 = vld [vmem:[#allocation8 + $0x4] ss:$8 sps:$4 sm:$0xff]   ;;  %v1662_v5 = vld [vmem:[#allocation8 + $0x14] ss:$8 sps:$4 sm:$0xff]  }
  0x83   :  { %343 = vmatprep.subr.bf16.mxu0 %v1577_v12  ;;  %589 = vmatpush1.bf16.msra.mxu1 %v1623_v33  ;;  %v1660_v6 = vld [vmem:[#allocation8 + $0x10] ss:$8 sps:$4 sm:$0xff]   ;;  %v1665_v7 = vld [vmem:[#allocation8 + $0x24] ss:$8 sps:$4 sm:$0xff]   ;;  %v1663_v8 = vld [vmem:[#allocation8 + $0x20] ss:$8 sps:$4 sm:$0xff]  }
  0x84   :  { %590 = vmatprep.subr.bf16.mxu1 %v1624_v34  ;;  %v1668_v9 = vld [vmem:[#allocation8 + $0x34] ss:$8 sps:$4 sm:$0xff]   ;;  %v1666_v10 = vld [vmem:[#allocation8 + $0x30] ss:$8 sps:$4 sm:$0xff]   ;;  %v1671_v11 = vld [vmem:[#allocation8 + $0x44] ss:$8 sps:$4 sm:$0xff]  }
  0x85   :  { %v1669_v12 = vld [vmem:[#allocation8 + $0x40] ss:$8 sps:$4 sm:$0xff]   ;;  %v1672_v14 = vld [vmem:[#allocation8 + $0x50] ss:$8 sps:$4 sm:$0xff]   ;;  %v1677_v15 = vld [vmem:[#allocation8 + $0x64] ss:$8 sps:$4 sm:$0xff]  }
  0x86   :  { %344 = vmatpush1.bf16.msra.mxu0 %v1579_v13  ;;  %v1674_v13 = vld [vmem:[#allocation8 + $0x54] ss:$8 sps:$4 sm:$0xff]   ;;  %v1675_v16 = vld [vmem:[#allocation8 + $0x60] ss:$8 sps:$4 sm:$0xff]   ;;  %v1678_v18 = vld [vmem:[#allocation8 + $0x70] ss:$8 sps:$4 sm:$0xff]  }
  0x87   :  { %345 = vmatprep.subr.bf16.mxu0 %v1580_v19  ;;  %591 = vmatpush1.bf16.msra.mxu1 %v1626_v36  ;;  %v1680_v17 = vld [vmem:[#allocation8 + $0x74] ss:$8 sps:$4 sm:$0xff]   ;;  %v1683_v19 = vld [vmem:[#allocation8 + $0x84] ss:$8 sps:$4 sm:$0xff]   ;;  %v1684_v22 = vld [vmem:[#allocation8 + $0x90] ss:$8 sps:$4 sm:$0xff]  }
  0x88   :  { %592 = vmatprep.subr.bf16.mxu1 %v1627_v38  ;;  %v1686_v21 = vld [vmem:[#allocation8 + $0x94] ss:$8 sps:$4 sm:$0xff]   ;;  %v1690_v26 = vld [vmem:[#allocation8 + $0xb0] ss:$8 sps:$4 sm:$0xff]  }
  0x89   :  { %v1692_v25 = vld [vmem:[#allocation8 + $0xb4] ss:$8 sps:$4 sm:$0xff]   ;;  %v1696_v30 = vld [vmem:[#allocation8 + $0xd0] ss:$8 sps:$4 sm:$0xff]  }
  0x8a   :  { %346 = vmatpush1.bf16.msra.mxu0 %v1582_v20  ;;  %v1681_v20 = vld [vmem:[#allocation8 + $0x80] ss:$8 sps:$4 sm:$0xff]   ;;  %v1698_v29 = vld [vmem:[#allocation8 + $0xd4] ss:$8 sps:$4 sm:$0xff]   ;;  %v152_v34 = vld [vmem:[%s2170_s2] sm:$0x3] }
  0x8b   :  { %347 = vmatprep.subr.bf16.mxu0 %v1583_v23  ;;  %593 = vmatpush1.bf16.msra.mxu1 %v1629_v40  ;;  %v1689_v23 = vld [vmem:[#allocation8 + $0xa4] ss:$8 sps:$4 sm:$0xff]  }
  0x8c   :  { %594 = vmatprep.subr.bf16.mxu1 %v1630_v42 }
  0x8e   :  { %348 = vmatpush1.bf16.msra.mxu0 %v1585_v24  ;;  %v1687_v24 = vld [vmem:[#allocation8 + $0xa0] ss:$8 sps:$4 sm:$0xff]  }
  0x8f   :  { %349 = vmatprep.subr.bf16.mxu0 %v1586_v27  ;;  %595 = vmatpush1.bf16.msra.mxu1 %v1632_v44  ;;  %v1695_v27 = vld [vmem:[#allocation8 + $0xc4] ss:$8 sps:$4 sm:$0xff]  }
  0x90   :  { %596 = vmatprep.subr.bf16.mxu1 %v1633_v46 }
  0x92   :  { %350 = vmatpush1.bf16.msra.mxu0 %v1588_v28  ;;  %v1693_v28 = vld [vmem:[#allocation8 + $0xc0] ss:$8 sps:$4 sm:$0xff]  }
  0x93   :  { %351 = vmatprep.subr.bf16.mxu0 %v1589_v31  ;;  %597 = vmatpush1.bf16.msra.mxu1 %v1635_v48  ;;  %v154_v31 = vlaneseq  ;;  %v1701_v48 = vld [vmem:[#allocation8 + $0xe4] ss:$8 sps:$4 sm:$0xff]  }
  0x94   :  { %598 = vmatprep.subr.bf16.mxu1 %v1636_v50  ;;  %v1704_v50 = vld [vmem:[#allocation8 + $0xf4] ss:$8 sps:$4 sm:$0xff]  }
  0x96   :  { %352 = vmatpush1.bf16.msra.mxu0 %v1591_v32  ;;  %v155_v32 = vshrl.u32 %v154_v31, 7  ;;  %v1752_v31 = vld [vmem:[#allocation10 + $0xf4] ss:$8 sps:$4 sm:$0xff]  }
  0x97   :  { %353 = vmatprep.subr.bf16.mxu0 %v1592_v35  ;;  %599 = vmatpush1.bf16.msra.mxu1 %v1638_v52  ;;  %v1705_v52 = vld [vmem:[#allocation10] ss:$8 sps:$4 sm:$0xff]  }
  0x98   :  { %600 = vmatprep.subr.bf16.mxu1 %v1639_v54  ;;  %v2127_v33 = vsub.s32 0, %v155_v32  ;;  %v2132_v35 = vsub.s32 1, %v155_v32  ;;  %v1710_v54 = vld [vmem:[#allocation10 + $0x14] ss:$8 sps:$4 sm:$0xff]   ;;  %v1750_v32 = vld [vmem:[#allocation10 + $0xf0] ss:$8 sps:$4 sm:$0xff]  }
  0x9a   :  { %354 = vmatpush1.bf16.msra.mxu0 %v1594_v37  ;;  %v157_v36 = vrot.slane %v152_v34, %v2127_v33  ;;  %v161_v37 = vrot.slane %v152_v34, %v2132_v35  ;;  %v1753_v34 = vld [vmem:[#allocation11] ss:$8 sps:$4 sm:$0xff]  }
  0x9b   :  { %355 = vmatprep.subr.bf16.mxu0 %v1595_v39  ;;  %601 = vmatpush1.bf16.msra.mxu1 %v1641_v55  ;;  %v1708_v55 = vld [vmem:[#allocation10 + $0x10] ss:$8 sps:$4 sm:$0xff]  }
  0x9c   :  { %602 = vmatprep.subr.bf16.mxu1 %v1642_v56  ;;  %v1713_v56 = vld [vmem:[#allocation10 + $0x24] ss:$8 sps:$4 sm:$0xff]  }
  0x9e   :  { %356 = vmatpush1.bf16.msra.mxu0 %v1597_v41 }
  0x9f   :  { %357 = vmatprep.subr.bf16.mxu0 %v1598_v43  ;;  %603 = vmatpush1.bf16.msra.mxu1 %v1644_v58  ;;  %v1716_v58 = vld [vmem:[#allocation10 + $0x34] ss:$8 sps:$4 sm:$0xff]  }
  0xa0   :  { %604 = vmatprep.subr.bf16.mxu1 %v1645_v59  ;;  %v1714_v59 = vld [vmem:[#allocation10 + $0x30] ss:$8 sps:$4 sm:$0xff]  }
  0xa2   :  { %358 = vmatpush1.bf16.msra.mxu0 %v1600_v45 }
  0xa3   :  { %359 = vmatprep.subr.bf16.mxu0 %v1601_v47  ;;  %605 = vmatpush1.bf16.msra.mxu1 %v1647_v60  ;;  %v1719_v60 = vld [vmem:[#allocation10 + $0x44] ss:$8 sps:$4 sm:$0xff]  }
  0xa4   :  { %606 = vmatprep.subr.bf16.mxu1 %v1648_v61  ;;  %v1717_v61 = vld [vmem:[#allocation10 + $0x40] ss:$8 sps:$4 sm:$0xff]  }
  0xa6   :  { %360 = vmatpush1.bf16.msra.mxu0 %v1603_v49  ;;  %v1699_v49 = vld [vmem:[#allocation8 + $0xe0] ss:$8 sps:$4 sm:$0xff]  }
  0xa7   :  { %361 = vmatprep.subr.bf16.mxu0 %v1604_v51  ;;  %607 = vmatpush1.bf16.msra.mxu1 %v1650_v62  ;;  %v1702_v51 = vld [vmem:[#allocation8 + $0xf0] ss:$8 sps:$4 sm:$0xff]   ;;  %v1722_v62 = vld [vmem:[#allocation10 + $0x54] ss:$8 sps:$4 sm:$0xff]  }
  0xa8   :  { %608 = vmatprep.subr.bf16.mxu1 %v1651_v63  ;;  %v1720_v63 = vld [vmem:[#allocation10 + $0x50] ss:$8 sps:$4 sm:$0xff]  }
  0xaa   :  { %362 = vmatpush1.bf16.msra.mxu0 %v1606_v53  ;;  %v1707_v53 = vld [vmem:[#allocation10 + $0x4] ss:$8 sps:$4 sm:$0xff]  }
  0xab   :  { %609 = vmatpush1.bf16.msra.mxu1 %v1653_v0  ;;  %829 = vmatprep.subr.bf16.mxu0 %v1659_v4  ;;  %v1725_v0 = vld [vmem:[#allocation10 + $0x64] ss:$8 sps:$4 sm:$0xff]  }
  0xac   :  { %610 = vmatprep.subr.bf16.mxu1 %v1654_v1  ;;  %v1723_v1 = vld [vmem:[#allocation10 + $0x60] ss:$8 sps:$4 sm:$0xff]   ;;  %v1731_v4 = vld [vmem:[#allocation10 + $0x84] ss:$8 sps:$4 sm:$0xff]  }
  0xad   :  { %364 = vmatmul.mubr.bf16.vlgmr.msra.gmra.mrb[0].mxu0 %v1388_v57  ;;  %v1711_v57 = vld [vmem:[#allocation10 + $0x20] ss:$8 sps:$4 sm:$0xff]  }
  0xae   :  { %830 = vmatpush1.bf16.msra.mxu0 %v1657_v3  ;;  %v1726_v3 = vld [vmem:[#allocation10 + $0x70] ss:$8 sps:$4 sm:$0xff]  }
  0xaf   :  { %611 = vmatpush1.bf16.msra.mxu1 %v1656_v2  ;;  %831 = vmatprep.subr.bf16.mxu0 %v1662_v5  ;;  %v1728_v2 = vld [vmem:[#allocation10 + $0x74] ss:$8 sps:$4 sm:$0xff]   ;;  %v1729_v5 = vld [vmem:[#allocation10 + $0x80] ss:$8 sps:$4 sm:$0xff]  }
  0xb0   :  { %1076 = vmatprep.subr.bf16.mxu1 %v1707_v53  ;;  %v1782_v53 = vld [vmem:[#allocation11 + $0x94] ss:$8 sps:$4 sm:$0xff]  }
  0xb2   :  { %832 = vmatpush1.bf16.msra.mxu0 %v1660_v6  ;;  %v1734_v6 = vld [vmem:[#allocation10 + $0x94] ss:$8 sps:$4 sm:$0xff]  }
  0xb3   :  { %833 = vmatprep.subr.bf16.mxu0 %v1665_v7  ;;  %v1732_v7 = vld [vmem:[#allocation10 + $0x90] ss:$8 sps:$4 sm:$0xff]  }
  0xb6   :  { %834 = vmatpush1.bf16.msra.mxu0 %v1663_v8  ;;  %v1737_v8 = vld [vmem:[#allocation10 + $0xa4] ss:$8 sps:$4 sm:$0xff]  }
  0xb7   :  { %835 = vmatprep.subr.bf16.mxu0 %v1668_v9  ;;  %v1735_v9 = vld [vmem:[#allocation10 + $0xa0] ss:$8 sps:$4 sm:$0xff]  }
  0xba   :  { %836 = vmatpush1.bf16.msra.mxu0 %v1666_v10  ;;  %v1740_v10 = vld [vmem:[#allocation10 + $0xb4] ss:$8 sps:$4 sm:$0xff]  }
  0xbb   :  { %837 = vmatprep.subr.bf16.mxu0 %v1671_v11  ;;  %v1738_v11 = vld [vmem:[#allocation10 + $0xb0] ss:$8 sps:$4 sm:$0xff]  }
  0xbe   :  { %838 = vmatpush1.bf16.msra.mxu0 %v1669_v12  ;;  %v1743_v12 = vld [vmem:[#allocation10 + $0xc4] ss:$8 sps:$4 sm:$0xff]  }
  0xbf   :  { %839 = vmatprep.subr.bf16.mxu0 %v1674_v13  ;;  %v1741_v13 = vld [vmem:[#allocation10 + $0xc0] ss:$8 sps:$4 sm:$0xff]  }
  0xc2   :  { %840 = vmatpush1.bf16.msra.mxu0 %v1672_v14  ;;  %v1746_v14 = vld [vmem:[#allocation10 + $0xd4] ss:$8 sps:$4 sm:$0xff]  }
  0xc3   :  { %841 = vmatprep.subr.bf16.mxu0 %v1677_v15  ;;  %v1744_v15 = vld [vmem:[#allocation10 + $0xd0] ss:$8 sps:$4 sm:$0xff]  }
  0xc6   :  { %842 = vmatpush1.bf16.msra.mxu0 %v1675_v16  ;;  %v1749_v16 = vld [vmem:[#allocation10 + $0xe4] ss:$8 sps:$4 sm:$0xff]  }
  0xc7   :  { %843 = vmatprep.subr.bf16.mxu0 %v1680_v17  ;;  %v1747_v17 = vld [vmem:[#allocation10 + $0xe0] ss:$8 sps:$4 sm:$0xff]  }
  0xca   :  { %844 = vmatpush1.bf16.msra.mxu0 %v1678_v18  ;;  %v408_v18 = vld [vmem:[%s2172_s4] sm:$0x3] }
  0xcb   :  { %845 = vmatprep.subr.bf16.mxu0 %v1683_v19  ;;  %v413_v19 = vrot.slane %v408_v18, %v2127_v33 }
  0xce   :  { %846 = vmatpush1.bf16.msra.mxu0 %v1681_v20  ;;  %v417_v20 = vrot.slane %v408_v18, %v2132_v35 }
  0xcf   :  { %847 = vmatprep.subr.bf16.mxu0 %v1686_v21 }
  0xd2   :  { %848 = vmatpush1.bf16.msra.mxu0 %v1684_v22 }
  0xd3   :  { %849 = vmatprep.subr.bf16.mxu0 %v1689_v23 }
  0xd6   :  { %850 = vmatpush1.bf16.msra.mxu0 %v1687_v24 }
  0xd7   :  { %851 = vmatprep.subr.bf16.mxu0 %v1692_v25 }
  0xda   :  { %852 = vmatpush1.bf16.msra.mxu0 %v1690_v26 }
  0xdb   :  { %853 = vmatprep.subr.bf16.mxu0 %v1695_v27 }
  0xde   :  { %854 = vmatpush1.bf16.msra.mxu0 %v1693_v28 }
  0xdf   :  { %855 = vmatprep.subr.bf16.mxu0 %v1698_v29 }
  0xe2   :  { %856 = vmatpush1.bf16.msra.mxu0 %v1696_v30 }
  0xe3   :  { %857 = vmatprep.subr.bf16.mxu0 %v1701_v48  ;;  %v1771_v48 = vld [vmem:[#allocation11 + $0x60] ss:$8 sps:$4 sm:$0xff]  }
  0xe6   :  { %858 = vmatpush1.bf16.msra.mxu0 %v1699_v49  ;;  %v1776_v49 = vld [vmem:[#allocation11 + $0x74] ss:$8 sps:$4 sm:$0xff]  }
  0xe7   :  { %859 = vmatprep.subr.bf16.mxu0 %v1704_v50  ;;  %v1774_v50 = vld [vmem:[#allocation11 + $0x70] ss:$8 sps:$4 sm:$0xff]  }
  0xea   :  { %860 = vmatpush1.bf16.msra.mxu0 %v1702_v51  ;;  %v1779_v51 = vld [vmem:[#allocation11 + $0x84] ss:$8 sps:$4 sm:$0xff]  }
 0x180   :  { %v365_v38 = vpop.f32.mrb[0].mxu0 }
 0x181   :  { %v366_v39 = vadd.f32 %v365_v38, %v157_v36  ;;  %v367_v40 = vpop.f32.mrb[1].mxu0  ;;  %v1755_v36 = vld [vmem:[#allocation11 + $0x4] ss:$8 sps:$4 sm:$0xff]   ;;  %v1756_v38 = vld [vmem:[#allocation11 + $0x10] ss:$8 sps:$4 sm:$0xff]  }
 0x182   :  { %v368_v41 = vadd.f32 %v367_v40, %v161_v37  ;;  %v369_v42 = vpop.f32.mrb[2].mxu0  ;;  %v1758_v37 = vld [vmem:[#allocation11 + $0x14] ss:$8 sps:$4 sm:$0xff]   ;;  %1325 = vmatprep.subr.bf16.mxu0 %v1755_v36  ;;  %v1759_v40 = vld [vmem:[#allocation11 + $0x20] ss:$8 sps:$4 sm:$0xff]  }
 0x183   :  { %v372_v43 = vmax.f32 %v366_v39, 0.0  ;;  %v370_v44 = vpop.f32.mrb[3].mxu0  ;;  %v1761_v39 = vld [vmem:[#allocation11 + $0x24] ss:$8 sps:$4 sm:$0xff]   ;;  %v1762_v42 = vld [vmem:[#allocation11 + $0x30] ss:$8 sps:$4 sm:$0xff]  }
 0x184   :  { %v373_v45 = vmax.f32 %v368_v41, 0.0  ;;  %v1764_v41 = vld [vmem:[#allocation11 + $0x34] ss:$8 sps:$4 sm:$0xff]   ;;  %v1765_v44 = vld [vmem:[#allocation11 + $0x40] ss:$8 sps:$4 sm:$0xff]  }
 0x185   :  { %v374_v47 = vpack.c.bf16 %v372_v43, %v372_v43  ;;  %v1767_v43 = vld [vmem:[#allocation11 + $0x44] ss:$8 sps:$4 sm:$0xff]  }
 0x186   :  { %v375_v46 = vpack.c.bf16 %v373_v45, %v373_v45  ;;  %v1770_v45 = vld [vmem:[#allocation11 + $0x54] ss:$8 sps:$4 sm:$0xff]  }
 0x188   :  { %612 = vmatprep.mubr.bf16.mxu1 %v375_v46  ;;  %v1768_v46 = vld [vmem:[#allocation11 + $0x50] ss:$8 sps:$4 sm:$0xff]  }
 0x189   :  { %613 = vmatmul.mubr.bf16.vlgmr.msra.gmra.mrb[0].mxu1 %v374_v47  ;;  %v1773_v47 = vld [vmem:[#allocation11 + $0x64] ss:$8 sps:$4 sm:$0xff]  }
 0x18a   :  { %1077 = vmatpush1.bf16.msra.mxu1 %v1705_v52  ;;  %v1777_v52 = vld [vmem:[#allocation11 + $0x80] ss:$8 sps:$4 sm:$0xff]  }
 0x18b   :  { %1078 = vmatprep.subr.bf16.mxu1 %v1710_v54  ;;  %v1780_v54 = vld [vmem:[#allocation11 + $0x90] ss:$8 sps:$4 sm:$0xff]  }
 0x18e   :  { %1079 = vmatpush1.bf16.msra.mxu1 %v1708_v55  ;;  %v1785_v55 = vld [vmem:[#allocation11 + $0xa4] ss:$8 sps:$4 sm:$0xff]  }
 0x18f   :  { %1080 = vmatprep.subr.bf16.mxu1 %v1713_v56  ;;  %v1783_v56 = vld [vmem:[#allocation11 + $0xa0] ss:$8 sps:$4 sm:$0xff]  }
 0x192   :  { %1081 = vmatpush1.bf16.msra.mxu1 %v1711_v57  ;;  %v1788_v57 = vld [vmem:[#allocation11 + $0xb4] ss:$8 sps:$4 sm:$0xff]  }
 0x193   :  { %1082 = vmatprep.subr.bf16.mxu1 %v1716_v58  ;;  %v1786_v58 = vld [vmem:[#allocation11 + $0xb0] ss:$8 sps:$4 sm:$0xff]  }
 0x196   :  { %1083 = vmatpush1.bf16.msra.mxu1 %v1714_v59  ;;  %v1791_v59 = vld [vmem:[#allocation11 + $0xc4] ss:$8 sps:$4 sm:$0xff]  }
 0x197   :  { %1084 = vmatprep.subr.bf16.mxu1 %v1719_v60  ;;  %v1789_v60 = vld [vmem:[#allocation11 + $0xc0] ss:$8 sps:$4 sm:$0xff]  }
 0x19a   :  { %1085 = vmatpush1.bf16.msra.mxu1 %v1717_v61  ;;  %v1794_v61 = vld [vmem:[#allocation11 + $0xd4] ss:$8 sps:$4 sm:$0xff]  }
 0x19b   :  { %1086 = vmatprep.subr.bf16.mxu1 %v1722_v62  ;;  %v1792_v62 = vld [vmem:[#allocation11 + $0xd0] ss:$8 sps:$4 sm:$0xff]  }
 0x19e   :  { %1087 = vmatpush1.bf16.msra.mxu1 %v1720_v63  ;;  %v657_v63 = vld [vmem:[%s2174_s6] sm:$0x3] }
 0x19f   :  { %1088 = vmatprep.subr.bf16.mxu1 %v1725_v0  ;;  %v662_v0 = vrot.slane %v657_v63, %v2127_v33 }
 0x1a2   :  { %1089 = vmatpush1.bf16.msra.mxu1 %v1723_v1  ;;  %v666_v1 = vrot.slane %v657_v63, %v2132_v35 }
 0x1a3   :  { %1090 = vmatprep.subr.bf16.mxu1 %v1728_v2 }
 0x1a6   :  { %1091 = vmatpush1.bf16.msra.mxu1 %v1726_v3 }
 0x1a7   :  { %1092 = vmatprep.subr.bf16.mxu1 %v1731_v4 }
 0x1aa   :  { %1093 = vmatpush1.bf16.msra.mxu1 %v1729_v5 }
 0x1ab   :  { %1094 = vmatprep.subr.bf16.mxu1 %v1734_v6 }
 0x1ae   :  { %1095 = vmatpush1.bf16.msra.mxu1 %v1732_v7 }
 0x1af   :  { %1096 = vmatprep.subr.bf16.mxu1 %v1737_v8 }
 0x1b2   :  { %1097 = vmatpush1.bf16.msra.mxu1 %v1735_v9 }
 0x1b3   :  { %1098 = vmatprep.subr.bf16.mxu1 %v1740_v10  ;;  %v1797_v10 = vld [vmem:[#allocation11 + $0xe4] ss:$8 sps:$4 sm:$0xff]  }
 0x1b6   :  { %1099 = vmatpush1.bf16.msra.mxu1 %v1738_v11  ;;  %v1795_v11 = vld [vmem:[#allocation11 + $0xe0] ss:$8 sps:$4 sm:$0xff]  }
 0x1b7   :  { %1100 = vmatprep.subr.bf16.mxu1 %v1743_v12  ;;  %v1800_v12 = vld [vmem:[#allocation11 + $0xf4] ss:$8 sps:$4 sm:$0xff]  }
 0x1ba   :  { %1101 = vmatpush1.bf16.msra.mxu1 %v1741_v13  ;;  %v1798_v13 = vld [vmem:[#allocation11 + $0xf0] ss:$8 sps:$4 sm:$0xff]  }
 0x1bb   :  { %1102 = vmatprep.subr.bf16.mxu1 %v1746_v14  ;;  %v904_v14 = vld [vmem:[%s2176_s8] sm:$0x3]  ;;  %s1973_s8 = smov [#allocation13]  }
 0x1bc   :  { %s1376_s5 = sshll.u32 %s1973_s8, 4  ;;  %s1377_s5 = int_to_ptr.vmem [resolvable:$true] %s1376_s5 }
 0x1bd   :  { %s1933_s13 = scalar_lea.vmem %s1377_s5, 256  ;;  %p1938_p7 = scmp.lt.s32.totalorder %s1377_s5, %s1377_s5 }
 0x1be   :  { %1103 = vmatpush1.bf16.msra.mxu1 %v1744_v15  ;;  %v909_v15 = vrot.slane %v904_v14, %v2127_v33  ;;  %p1934_p6 = scmp.ne.s32.totalorder %s1377_s5, %s1933_s13  ;;  %p1939_p8 = scmp.lt.s32.totalorder %s1933_s13, %s1933_s13 }
 0x1bf   :  { %1104 = vmatprep.subr.bf16.mxu1 %v1749_v16  ;;  %v913_v16 = vrot.slane %v904_v14, %v2132_v35 }
 0x1c0   :  { %p1940_p9 = por %p1939_p8, %p1938_p7 }
 0x1c2   :  { %1105 = vmatpush1.bf16.msra.mxu1 %v1747_v17  ;;  %p1941_p10 = pnand %p1940_p9, %p1934_p6 }
 0x1c3   :  { %1106 = vmatprep.subr.bf16.mxu1 %v1752_v31 }
 0x1c6   :  { %1107 = vmatpush1.bf16.msra.mxu1 %v1750_v32 }
 0x25c   :  { %v614_v21 = vpop.f32.mrb[0].mxu1 }
 0x25d   :  { %v615_v22 = vadd.f32 %v614_v21, %v413_v19  ;;  %v616_v23 = vpop.f32.mrb[1].mxu1 }
 0x25e   :  { %v617_v24 = vadd.f32 %v616_v23, %v417_v20  ;;  %v618_v25 = vpop.f32.mrb[2].mxu1 }
 0x25f   :  { %v621_v26 = vmax.f32 %v615_v22, 0.0  ;;  %v619_v27 = vpop.f32.mrb[3].mxu1 }
 0x260   :  { %v622_v28 = vmax.f32 %v617_v24, 0.0  ;;  %v1153_v27 = vld [vmem:[%s2178_s10] sm:$0x3] }
 0x261   :  { %v623_v30 = vpack.c.bf16 %v621_v26, %v621_v26 }
 0x262   :  { %v624_v29 = vpack.c.bf16 %v622_v28, %v622_v28  ;;  %v1158_v28 = vrot.slane %v1153_v27, %v2127_v33 }
 0x264   :  { %861 = vmatprep.mubr.bf16.mxu0 %v624_v29  ;;  %v1162_v29 = vrot.slane %v1153_v27, %v2132_v35 }
 0x265   :  { %862 = vmatmul.mubr.bf16.vlgmr.msra.gmra.mrb[4].mxu0 %v623_v30 }
 0x266   :  { %1326 = vmatpush1.bf16.msra.mxu0 %v1753_v34 }
 0x267   :  { %1327 = vmatprep.subr.bf16.mxu0 %v1758_v37 }
 0x26a   :  { %1328 = vmatpush1.bf16.msra.mxu0 %v1756_v38 }
 0x26b   :  { %1329 = vmatprep.subr.bf16.mxu0 %v1761_v39 }
 0x26e   :  { %1330 = vmatpush1.bf16.msra.mxu0 %v1759_v40 }
 0x26f   :  { %1331 = vmatprep.subr.bf16.mxu0 %v1764_v41 }
 0x272   :  { %1332 = vmatpush1.bf16.msra.mxu0 %v1762_v42 }
 0x273   :  { %1333 = vmatprep.subr.bf16.mxu0 %v1767_v43 }
 0x276   :  { %1334 = vmatpush1.bf16.msra.mxu0 %v1765_v44 }
 0x277   :  { %1335 = vmatprep.subr.bf16.mxu0 %v1770_v45 }
 0x27a   :  { %1336 = vmatpush1.bf16.msra.mxu0 %v1768_v46 }
 0x27b   :  { %1337 = vmatprep.subr.bf16.mxu0 %v1773_v47 }
 0x27e   :  { %1338 = vmatpush1.bf16.msra.mxu0 %v1771_v48 }
 0x27f   :  { %1339 = vmatprep.subr.bf16.mxu0 %v1776_v49 }
 0x282   :  { %1340 = vmatpush1.bf16.msra.mxu0 %v1774_v50 }
 0x283   :  { %1341 = vmatprep.subr.bf16.mxu0 %v1779_v51 }
 0x286   :  { %1342 = vmatpush1.bf16.msra.mxu0 %v1777_v52 }
 0x287   :  { %1343 = vmatprep.subr.bf16.mxu0 %v1782_v53 }
 0x28a   :  { %1344 = vmatpush1.bf16.msra.mxu0 %v1780_v54 }
 0x28b   :  { %1345 = vmatprep.subr.bf16.mxu0 %v1785_v55 }
 0x28e   :  { %1346 = vmatpush1.bf16.msra.mxu0 %v1783_v56 }
 0x28f   :  { %1347 = vmatprep.subr.bf16.mxu0 %v1788_v57 }
 0x292   :  { %1348 = vmatpush1.bf16.msra.mxu0 %v1786_v58 }
 0x293   :  { %1349 = vmatprep.subr.bf16.mxu0 %v1791_v59 }
 0x296   :  { %1350 = vmatpush1.bf16.msra.mxu0 %v1789_v60 }
 0x297   :  { %1351 = vmatprep.subr.bf16.mxu0 %v1794_v61 }
 0x29a   :  { %1352 = vmatpush1.bf16.msra.mxu0 %v1792_v62 }
 0x29b   :  { %1353 = vmatprep.subr.bf16.mxu0 %v1797_v10 }
 0x29e   :  { %1354 = vmatpush1.bf16.msra.mxu0 %v1795_v11 }
 0x29f   :  { %1355 = vmatprep.subr.bf16.mxu0 %v1800_v12 }
 0x2a2   :  { %1356 = vmatpush1.bf16.msra.mxu0 %v1798_v13 }
 0x338   :  { %v863_v2 = vpop.f32.mrb[4].mxu0 }
 0x339   :  { %v864_v3 = vadd.f32 %v863_v2, %v662_v0  ;;  %v865_v4 = vpop.f32.mrb[5].mxu0 }
 0x33a   :  { %v866_v5 = vadd.f32 %v865_v4, %v666_v1  ;;  %v867_v6 = vpop.f32.mrb[6].mxu0 }
 0x33b   :  { %v868_v7 = vpop.f32.mrb[7].mxu0  ;;  %v870_v9 = vpack.c.bf16 %v864_v3, %v864_v3 }
 0x33c   :  { %v871_v8 = vpack.c.bf16 %v866_v5, %v866_v5 }
 0x33e   :  { %1108 = vmatprep.mubr.bf16.mxu1 %v871_v8 }
 0x33f   :  { %1109 = vmatmul.mubr.bf16.vlgmr.msra.gmra.mrb[4].mxu1 %v870_v9 }
 0x412   :  { %v1110_v17 = vpop.f32.mrb[4].mxu1 }
 0x413   :  { %v1111_v18 = vadd.f32 %v1110_v17, %v909_v15  ;;  %v1112_v19 = vpop.f32.mrb[5].mxu1 }
 0x414   :  { %v1113_v20 = vadd.f32 %v1112_v19, %v913_v16  ;;  %v1114_v21 = vpop.f32.mrb[6].mxu1 }
 0x415   :  { %v1117_v22 = vmax.f32 %v1111_v18, 0.0  ;;  %v1115_v23 = vpop.f32.mrb[7].mxu1 }
 0x416   :  { %v1118_v24 = vmax.f32 %v1113_v20, 0.0 }
 0x417   :  { %v1119_v26 = vpack.c.bf16 %v1117_v22, %v1117_v22 }
 0x418   :  { %v1120_v25 = vpack.c.bf16 %v1118_v24, %v1118_v24 }
 0x41a   :  { %1357 = vmatprep.mubr.bf16.mxu0 %v1120_v25 }
 0x41b   :  { %1358 = vmatmul.mubr.bf16.vlgmr.msra.gmra.mrb[8].mxu0 %v1119_v26 }
 0x4ee   :  { %v1359_v30 = vpop.f32.mrb[8].mxu0 }
 0x4ef   :  { %v1360_v31 = vadd.f32 %v1359_v30, %v1158_v28  ;;  %v1361_v32 = vpop.f32.mrb[9].mxu0 }
 0x4f0   :  { %v1362_v34 = vadd.f32 %v1361_v32, %v1162_v29  ;;  %v1363_v36 = vpop.f32.mrb[10].mxu0 }
 0x4f1   :  { %v1366_v37 = vadd.f32 %v1360_v31, %v864_v3  ;;  %v1364_v38 = vpop.f32.mrb[11].mxu0 }
 0x4f2   :  { %v1367_v39 = vadd.f32 %v1362_v34, %v866_v5 }
 0x4f3   :  { %1368 = vst [vmem:[#allocation13] sm:$0xff] %v1366_v37 }
 0x4f4   :  { %1369 = vst [vmem:[#allocation13 + $0x8] sm:$0xff] %v1367_v39 }
 0x4f5   :  { %1944 = shalt.err (!%p1941_p10)
}
 0x4f6   :  { %s1945_s21 = scalar_lea.hbm %s2179_s11, 256 }
 0x4f7   :  { %p1946_p11 = scmp.ne.s32.totalorder %s2179_s11, %s1945_s21  ;;  %p1949_p12 = scmp.lt.u32.totalorder %s1945_s21, %s2179_s11 }
 0x4f9   :  { %p1951_p13 = pnand %p1949_p12, %p1946_p11 }
 0x4fb   :  { %1954 = shalt.err (!%p1951_p13)
}
 0x4fc   :  { %1379 = dma.vmem_to_hbm [thread:$0]  %s1377_s5, 256, %s2179_s11, [#allocation4]  }
 0x4fd   :  { %1963 = dma.done.wait [#allocation4], 256  }
 0x4fe   :  { %1964 = vsyncadd [#allocation4], 4294967040 }
 0x4ff   :  { %1383 = vsyncpa [#allocation3], 1 }
 0x500   :  { %1384 = vsyncpa [#allocation6], 1 }
 0x501   :  { %1385 = vsyncpa [#allocation9], 1 }
 0x502   :  { %1386 = vsyncpa [#allocation12], 1 }
 0x503   :  { %1387 = vsyncpa [#allocation4], 1 }

</bundles_post_ra>
